<compile_context>
chip_gen: v6e
topology: v6e:2x2x1
jax: 0.10.0
libtpu: 0.0.40
codegen_flags: <defaults>
</compile_context>

<pallas_src>
import math

import jax
import jax.numpy as jnp
from jax.experimental import pallas as pl
from jax.experimental.pallas import tpu as pltpu

PAD_VALUE = 0.447


def _round_up(x: int, m: int) -> int:
    return -(-x // m) * m


def _bilinear_matrix(in_size: int, out_size: int) -> jnp.ndarray:
    """(out_size, in_size) matrix reproducing F.interpolate(mode='bilinear',
    align_corners=False) along one axis (half-pixel centers, edge clamp)."""
    scale = in_size / out_size
    dst = jnp.arange(out_size, dtype=jnp.float32)
    src = (dst + 0.5) * scale - 0.5
    src = jnp.maximum(src, 0.0)                     # PyTorch clamps negatives to 0
    i0f = jnp.floor(src)
    frac = src - i0f
    i0 = jnp.clip(i0f.astype(jnp.int32), 0, in_size - 1)
    i1 = jnp.minimum(i0 + 1, in_size - 1)
    rows = jnp.arange(out_size)
    m = jnp.zeros((out_size, in_size), jnp.float32)
    m = m.at[rows, i0].add(1.0 - frac)
    m = m.at[rows, i1].add(frac)
    return m


def _padded_scale_kernel(wh_ref, wwt_ref, pad_ref, img_ref, out_ref, tmp_ref):
    vis_h_al, h = wh_ref.shape            # rows of W_h (rounded up to sublane)
    w_pad = out_ref.shape[1]
    bblk = img_ref.shape[0] // h          # planes in this grid step
    h_pad = out_ref.shape[0] // bblk
    border_rows = h_pad - vis_h_al

    # Pass 1: W-resample ALL planes in one tall, lane-dense MXU matmul:
    #   (bblk*h, w) @ (w, w_pad) -> (bblk*h, w_pad)
    tmp_ref[...] = jnp.dot(
        img_ref[...], wwt_ref[...], preferred_element_type=jnp.float32
    ).astype(tmp_ref.dtype)

    pad = pad_ref[...]                    # (vis_h_al, w_pad) f32, hoisted
    border = None
    if border_rows > 0:                   # hoisted out of the per-plane loop
        border = jnp.full((border_rows, w_pad), PAD_VALUE, out_ref.dtype)

    # Pass 2: per-plane H-resample fused with pad-add + cast + store.  Only
    # one plane of f32 data is live at a time (no big intermediate to spill),
    # and store/VPU work of plane b overlaps the MXU matmul of plane b+1.
    for b in range(bblk):
        tmp_b = tmp_ref[pl.ds(b * h, h), :]
        vis = jnp.dot(wh_ref[...], tmp_b, preferred_element_type=jnp.float32)
        # W_h / W_w^T are exactly zero outside the visible region, so the
        # matmul result is exactly 0 there and adding the precomputed pad
        # block yields PAD_VALUE.  (Do not add any bias inside the matmuls.)
        vis = vis + pad
        out_ref[pl.ds(b * h_pad, vis_h_al), :] = vis.astype(out_ref.dtype)
        if border_rows > 0:
            # Rows >= round_up(vis_h, 8) are all-border: direct broadcast
            # fill, no MXU / pad-plane traffic.
            out_ref[pl.ds(b * h_pad + vis_h_al, border_rows), :] = border


def _choose_plane_batch(nc: int, per_plane_bytes: int, fixed_bytes: int,
                        vmem_budget: int, sub: int) -> int:
    """Planes per grid step, from the real double-buffered per-step footprint.

    Large enough for big DMAs / tall matmuls, small enough to fit the
    generation-aware VMEM budget, and capped so the grid has >= 4 steps when
    nc allows it (v7x shards the parallel axis across 2 TensorCores; each
    core then still gets prefetch/writeback overlap)."""
    avail = max(vmem_budget - fixed_bytes, per_plane_bytes)
    b = max(1, avail // per_plane_bytes)
    b = min(b, 32)
    if nc >= 4:
        b = min(b, max(1, nc // 4))       # keep >= 4 grid steps
    b = max(1, min(b, nc))
    # Keep (b * h) a multiple of 8 so the second-to-last block dim is
    # sublane-aligned even when h is not.
    b = _round_up(b, sub)
    return int(b)


def padded_scale(image: jnp.ndarray, ratio: float = 1.0, same_shape: bool = False,
                 bf16_matmul: bool = False):
    """JAX/Pallas equivalent of the PyTorch padded_scale transform.

    bf16_matmul: if True, f32 inputs are fed to the MXU in bf16 (f32 accum).
    ~0.4% interpolation bias but much faster on v5e/v6e/v7x; off by default
    to keep f32-exact interpolation.
    """
    if ratio == 1.0:
        return image

    n, c, h, w = image.shape
    s_h, s_w = int(h * ratio), int(w * ratio)
    if s_h <= 0 or s_w <= 0:
        raise ValueError(f"ratio={ratio} produces an empty scaled image {(s_h, s_w)}")

    if same_shape:
        h_pad, w_pad = h, w
    else:
        gs = 128
        h_pad = math.ceil(h * ratio / gs) * gs
        w_pad = math.ceil(w * ratio / gs) * gs

    out_dtype = image.dtype
    if image.dtype == jnp.bfloat16 or bf16_matmul:
        compute_dtype = jnp.bfloat16
    else:
        compute_dtype = jnp.float32

    # Visible part of the scaled image.  same_shape=True with ratio > 1 crops
    # bottom/right, matching F.pad with negative padding.
    vis_h, vis_w = min(s_h, h_pad), min(s_w, w_pad)
    # Rows handled by the matmul (sublane-rounded); rows beyond this are pure
    # border and get a direct fill.
    vis_h_al = min(_round_up(vis_h, 8), h_pad)

    # Interpolation matrices, zero-padded so rows/cols >= the scaled size
    # contribute exactly 0 to the matmul result.
    wh = jnp.zeros((vis_h_al, h), jnp.float32)
    wh = wh.at[:vis_h, :].set(_bilinear_matrix(h, s_h)[:vis_h])
    wwt = jnp.zeros((w, w_pad), jnp.float32)
    wwt = wwt.at[:, :vis_w].set(_bilinear_matrix(w, s_w)[:vis_w].T)
    wh = wh.astype(compute_dtype)
    wwt = wwt.astype(compute_dtype)

    # Small constant-border block covering only the matmul-produced rows:
    # PAD_VALUE where (row >= vis_h) or (col >= vis_w), 0 inside.
    pad_block = jnp.where(
        (jnp.arange(vis_h_al)[:, None] >= vis_h)
        | (jnp.arange(w_pad)[None, :] >= vis_w),
        PAD_VALUE, 0.0).astype(jnp.float32)

    nc = n * c
    planes2d = image.reshape(nc * h, w)
    if planes2d.dtype != compute_dtype:
        planes2d = planes2d.astype(compute_dtype)

    csize = jnp.dtype(compute_dtype).itemsize
    osize = jnp.dtype(out_dtype).itemsize

    # Generation-aware VMEM budget (v7x has 64 MiB physical vs 128 MiB on
    # v5e/v6e); leave headroom for compiler-internal scratch.
    try:
        vmem_cap = int(pltpu.get_tpu_info().vmem_capacity_bytes)
    except Exception:
        vmem_cap = 64 * 1024 * 1024       # conservative default (fits all gens)
    vmem_budget = max(vmem_cap - 8 * 1024 * 1024, 16 * 1024 * 1024)

    # Real per-step footprint (inputs/outputs double-buffered, scratch single,
    # plus f32 headroom for the pass-1 matmul result before the cast).
    fixed_bytes = 2 * (vis_h_al * h + w * w_pad) * csize + 2 * vis_h_al * w_pad * 4
    per_plane = (2 * h * w * csize            # image block
                 + 2 * h_pad * w_pad * osize  # output block
                 + h * w_pad * csize          # lane-dense W-resample scratch
                 + h * w_pad * 4)             # f32 pass-1 result headroom
    sub = 8 // math.gcd(h, 8)
    bblk = _choose_plane_batch(nc, per_plane, fixed_bytes, vmem_budget, sub)

    # Pad the plane count so every grid step reads a fully in-range block.
    nc_pad = _round_up(nc, bblk)
    if nc_pad > nc:
        planes2d = jnp.pad(planes2d, ((0, (nc_pad - nc) * h), (0, 0)))
    num_steps = nc_pad // bblk

    vmem_est = fixed_bytes + bblk * per_plane
    vmem_limit = int(min(max(vmem_est * 3 // 2, 32 * 1024 * 1024), vmem_budget))
    # TODO(synk): for very large planes where even bblk=1 exceeds the VMEM
    # budget, add a second grid axis tiling h_pad (and exploit the 2-nonzero
    # band structure of the bilinear matrices) instead of raising the limit.
    # TODO(synk): same_shape=True with w < 128 leaves stores non lane-dense
    # (worst on v5e); a (h_pad, NC*w_pad) output layout would fix it.

    cost = pl.CostEstimate(
        flops=2 * nc_pad * (h * w * w_pad + vis_h_al * h * w_pad),
        transcendentals=0,
        bytes_accessed=(nc_pad * h * w * csize + nc_pad * h_pad * w_pad * osize
                        + (vis_h_al * h + w * w_pad) * csize + vis_h_al * w_pad * 4),
    )

    def _build(single_buffer: bool):
        # Grid-invariant inputs don't benefit from double buffering.
        inv_kw = {"pipeline_mode": pl.Buffered(1)} if single_buffer else {}
        return pl.pallas_call(
            _padded_scale_kernel,
            out_shape=jax.ShapeDtypeStruct((nc_pad * h_pad, w_pad), out_dtype),
            grid_spec=pltpu.PrefetchScalarGridSpec(
                num_scalar_prefetch=0,
                grid=(num_steps,),
                in_specs=[
                    pl.BlockSpec((vis_h_al, h), lambda i: (0, 0), **inv_kw),   # W_h
                    pl.BlockSpec((w, w_pad), lambda i: (0, 0), **inv_kw),      # W_w^T
                    pl.BlockSpec((vis_h_al, w_pad), lambda i: (0, 0), **inv_kw),  # pad
                    pl.BlockSpec((bblk * h, w), lambda i: (i, 0)),             # planes
                ],
                out_specs=pl.BlockSpec((bblk * h_pad, w_pad), lambda i: (i, 0)),
                scratch_shapes=[pltpu.VMEM((bblk * h, w_pad), compute_dtype)],
            ),
            compiler_params=pltpu.CompilerParams(
                dimension_semantics=("parallel",),
                vmem_limit_bytes=vmem_limit,
            ),
            cost_estimate=cost,
        )

    try:
        out2d = _build(True)(wh, wwt, pad_block, planes2d)
    except Exception:
        # Fallback for JAX builds that don't plumb pipeline_mode through
        # pallas_call; identical kernel, just double-buffered invariants.
        out2d = _build(False)(wh, wwt, pad_block, planes2d)

    if nc_pad > nc:
        out2d = out2d[: nc * h_pad]
    return out2d.reshape(n, c, h_pad, w_pad)


class PaddedScale:
    """JAX/Pallas port of the PyTorch PaddedScale transform (no parameters)."""

    def __init__(self, ratio: float = 1.0, same_shape: bool = False,
                 bf16_matmul: bool = False):
        self.ratio = ratio
        self.same_shape = same_shape
        self.bf16_matmul = bf16_matmul

    def __call__(self, image):
        return padded_scale(image, self.ratio, self.same_shape, self.bf16_matmul)


def _padded_scale_ref(image, ratio: float, same_shape: bool):
    """Pure-JAX reference (same separable-bilinear math, no Pallas)."""
    if ratio == 1.0:
        return image
    n, c, h, w = image.shape
    s_h, s_w = int(h * ratio), int(w * ratio)
    if same_shape:
        h_pad, w_pad = h, w
    else:
        gs = 128
        h_pad = math.ceil(h * ratio / gs) * gs
        w_pad = math.ceil(w * ratio / gs) * gs
    vis_h, vis_w = min(s_h, h_pad), min(s_w, w_pad)
    wh = _bilinear_matrix(h, s_h)[:vis_h]
    ww = _bilinear_matrix(w, s_w)[:vis_w]
    scaled = jnp.einsum("ph,nchw,qw->ncpq", wh, image.astype(jnp.float32), ww,
                        precision=jax.lax.Precision.HIGHEST)
    out = jnp.full((n, c, h_pad, w_pad), PAD_VALUE, jnp.float32)
    out = out.at[:, :, :vis_h, :vis_w].set(scaled)
    return out.astype(image.dtype)


if __name__ == "__main__":
    key = jax.random.PRNGKey(0)
    x = jax.random.uniform(key, (2, 4, 16, 16), dtype=jnp.float32)

    # same_shape=False: scaled to (8, 8), padded up to the 128 grid -> (128, 128)
    y = PaddedScale(ratio=0.5, same_shape=False)(x)
    jax.block_until_ready(y)
    assert y.shape == (2, 4, 128, 128), y.shape
    y_ref = _padded_scale_ref(x, 0.5, False)
    assert float(jnp.max(jnp.abs(y - y_ref))) < 3e-2

    # same_shape=True: scaled to (8, 8), padded back to original (16, 16)
    y2 = PaddedScale(ratio=0.5, same_shape=True)(x)
    jax.block_until_ready(y2)
    assert y2.shape == (2, 4, 16, 16), y2.shape
    y2_ref = _padded_scale_ref(x, 0.5, True)
    assert float(jnp.max(jnp.abs(y2 - y2_ref))) < 3e-2

    # nc not divisible by the plane batch -> exercises the padded-planes path
    x3 = jax.random.uniform(jax.random.PRNGKey(1), (3, 3, 16, 16), dtype=jnp.float32)
    y4 = PaddedScale(ratio=0.5, same_shape=False)(x3)
    jax.block_until_ready(y4)
    assert y4.shape == (3, 3, 128, 128), y4.shape
    y4_ref = _padded_scale_ref(x3, 0.5, False)
    assert float(jnp.max(jnp.abs(y4 - y4_ref))) < 3e-2

    # ratio == 1.0 is an identity pass-through, as in the reference module.
    y3 = PaddedScale(ratio=1.0)(x)
    assert y3.shape == x.shape

    print("KERNEL_OK")
</pallas_src>

<mosaic_0001>
module attributes {stable_mosaic.version = 11 : i64} {
  func.func @_padded_scale_kernel(%arg0: i32, %arg1: memref<8x16xf32, #tpu.memory_space<vmem>>, %arg2: memref<16x128xf32, #tpu.memory_space<vmem>>, %arg3: memref<8x128xf32, #tpu.memory_space<vmem>>, %arg4: memref<32x16xf32, #tpu.memory_space<vmem>>, %arg5: memref<256x128xf32, #tpu.memory_space<vmem>>, %arg6: memref<32x128xf32, #tpu.memory_space<vmem>>) attributes {dimension_semantics = [#tpu.dimension_semantics<parallel>], iteration_bounds = array<i64: 4>, scalar_prefetch = 0 : i64, scratch_operands = 1 : i64, tpu.core_type = #tpu.core_type<tc>, window_params = [{pipeline_mode = #tpu.pipeline_mode<synchronous>, transform_indices = @transform_0, window_bounds = array<i64: 8, 16>}, {pipeline_mode = #tpu.pipeline_mode<synchronous>, transform_indices = @transform_1, window_bounds = array<i64: 16, 128>}, {pipeline_mode = #tpu.pipeline_mode<synchronous>, transform_indices = @transform_2, window_bounds = array<i64: 8, 128>}, {transform_indices = @transform_3, window_bounds = array<i64: 32, 16>}, {transform_indices = @transform_4, window_bounds = array<i64: 256, 128>}]} {
    %c0 = arith.constant 0 : index
    %c0_0 = arith.constant 0 : index
    %0 = vector.load %arg4[%c0, %c0_0] : memref<32x16xf32, #tpu.memory_space<vmem>>, vector<32x16xf32>
    %c0_1 = arith.constant 0 : index
    %c0_2 = arith.constant 0 : index
    %1 = vector.load %arg2[%c0_1, %c0_2] : memref<16x128xf32, #tpu.memory_space<vmem>>, vector<16x128xf32>
    %cst = arith.constant dense<0.000000e+00> : vector<32x128xf32>
    %2 = tpu.matmul %0, %1, %cst {dimension_numbers = #tpu.dot_dimension_numbers<[1], [0], [0], [1], [0, 0, 1, 1], [], []>} : vector<32x16xf32>, vector<16x128xf32>, vector<32x128xf32> -> vector<32x128xf32>
    %c0_3 = arith.constant 0 : index
    %c0_4 = arith.constant 0 : index
    %3 = vector.load %arg6[%c0_3, %c0_4] : memref<32x128xf32, #tpu.memory_space<vmem>>, vector<32x128xf32>
    tpu.vector_store %arg6[%c0_3, %c0_4], %2 {strides = array<i32>} : memref<32x128xf32, #tpu.memory_space<vmem>>, vector<32x128xf32>,
    %c0_5 = arith.constant 0 : index
    %c0_6 = arith.constant 0 : index
    %4 = vector.load %arg3[%c0_5, %c0_6] : memref<8x128xf32, #tpu.memory_space<vmem>>, vector<8x128xf32>
    %cst_7 = arith.constant 4.470000e-01 : f32
    %5 = vector.broadcast %cst_7 : f32 to vector<120x128xf32>
    %c0_8 = arith.constant 0 : index
    %c0_9 = arith.constant 0 : index
    %6 = vector.load %arg6[%c0_8, %c0_9] : memref<32x128xf32, #tpu.memory_space<vmem>>, vector<16x128xf32>
    %c0_10 = arith.constant 0 : index
    %c0_11 = arith.constant 0 : index
    %7 = vector.load %arg1[%c0_10, %c0_11] : memref<8x16xf32, #tpu.memory_space<vmem>>, vector<8x16xf32>
    %cst_12 = arith.constant dense<0.000000e+00> : vector<8x128xf32>
    %8 = tpu.matmul %7, %6, %cst_12 {dimension_numbers = #tpu.dot_dimension_numbers<[1], [0], [0], [1], [0, 0, 1, 1], [], []>} : vector<8x16xf32>, vector<16x128xf32>, vector<8x128xf32> -> vector<8x128xf32>
    %9 = arith.addf %8, %4 : vector<8x128xf32>
    %c0_13 = arith.constant 0 : index
    %c0_14 = arith.constant 0 : index
    %10 = vector.load %arg5[%c0_13, %c0_14] : memref<256x128xf32, #tpu.memory_space<vmem>>, vector<8x128xf32>
    tpu.vector_store %arg5[%c0_13, %c0_14], %9 {strides = array<i32>} : memref<256x128xf32, #tpu.memory_space<vmem>>, vector<8x128xf32>,
    %c8 = arith.constant 8 : index
    %c0_15 = arith.constant 0 : index
    %11 = vector.load %arg5[%c8, %c0_15] : memref<256x128xf32, #tpu.memory_space<vmem>>, vector<120x128xf32>
    tpu.vector_store %arg5[%c8, %c0_15], %5 {strides = array<i32>} : memref<256x128xf32, #tpu.memory_space<vmem>>, vector<120x128xf32>,
    %c16 = arith.constant 16 : index
    %c0_16 = arith.constant 0 : index
    %12 = vector.load %arg6[%c16, %c0_16] : memref<32x128xf32, #tpu.memory_space<vmem>>, vector<16x128xf32>
    %c0_17 = arith.constant 0 : index
    %c0_18 = arith.constant 0 : index
    %13 = vector.load %arg1[%c0_17, %c0_18] : memref<8x16xf32, #tpu.memory_space<vmem>>, vector<8x16xf32>
    %cst_19 = arith.constant dense<0.000000e+00> : vector<8x128xf32>
    %14 = tpu.matmul %13, %12, %cst_19 {dimension_numbers = #tpu.dot_dimension_numbers<[1], [0], [0], [1], [0, 0, 1, 1], [], []>} : vector<8x16xf32>, vector<16x128xf32>, vector<8x128xf32> -> vector<8x128xf32>
    %15 = arith.addf %14, %4 : vector<8x128xf32>
    %c128 = arith.constant 128 : index
    %c0_20 = arith.constant 0 : index
    %16 = vector.load %arg5[%c128, %c0_20] : memref<256x128xf32, #tpu.memory_space<vmem>>, vector<8x128xf32>
    tpu.vector_store %arg5[%c128, %c0_20], %15 {strides = array<i32>} : memref<256x128xf32, #tpu.memory_space<vmem>>, vector<8x128xf32>,
    %c136 = arith.constant 136 : index
    %c0_21 = arith.constant 0 : index
    %17 = vector.load %arg5[%c136, %c0_21] : memref<256x128xf32, #tpu.memory_space<vmem>>, vector<120x128xf32>
    tpu.vector_store %arg5[%c136, %c0_21], %5 {strides = array<i32>} : memref<256x128xf32, #tpu.memory_space<vmem>>, vector<120x128xf32>,
    return
  }
  func.func @transform_0(%arg0: i32) -> (i32, i32) {
    %c0_i32 = arith.constant 0 : i32
    %c0_i32_0 = arith.constant 0 : i32
    %c0_i32_1 = arith.constant 0 : i32
    return %c0_i32, %c0_i32_0 : i32, i32
  }
  func.func @transform_1(%arg0: i32) -> (i32, i32) {
    %c0_i32 = arith.constant 0 : i32
    %c0_i32_0 = arith.constant 0 : i32
    %c0_i32_1 = arith.constant 0 : i32
    return %c0_i32, %c0_i32_0 : i32, i32
  }
  func.func @transform_2(%arg0: i32) -> (i32, i32) {
    %c0_i32 = arith.constant 0 : i32
    %c0_i32_0 = arith.constant 0 : i32
    %c0_i32_1 = arith.constant 0 : i32
    return %c0_i32, %c0_i32_0 : i32, i32
  }
  func.func @transform_3(%arg0: i32) -> (i32, i32) {
    %c0_i32 = arith.constant 0 : i32
    %c0_i32_0 = arith.constant 0 : i32
    return %arg0, %c0_i32 : i32, i32
  }
  func.func @transform_4(%arg0: i32) -> (i32, i32) {
    %c0_i32 = arith.constant 0 : i32
    %c0_i32_0 = arith.constant 0 : i32
    return %arg0, %c0_i32 : i32, i32
  }
}

module attributes {stable_mosaic.version = 11 : i64} {
  func.func @_padded_scale_kernel(%arg0: i32, %arg1: memref<8x16xf32, #tpu.memory_space<vmem>>, %arg2: memref<16x128xf32, #tpu.memory_space<vmem>>, %arg3: memref<8x128xf32, #tpu.memory_space<vmem>>, %arg4: memref<32x16xf32, #tpu.memory_space<vmem>>, %arg5: memref<256x128xf32, #tpu.memory_space<vmem>>, %arg6: memref<32x128xf32, #tpu.memory_space<vmem>>) attributes {dimension_semantics = [#tpu.dimension_semantics<parallel>], iteration_bounds = array<i64: 4>, scalar_prefetch = 0 : i64, scratch_operands = 1 : i64, tpu.core_type = #tpu.core_type<tc>, window_params = [{pipeline_mode = #tpu.pipeline_mode<synchronous>, transform_indices = @transform_0, window_bounds = array<i64: 8, 16>}, {pipeline_mode = #tpu.pipeline_mode<synchronous>, transform_indices = @transform_1, window_bounds = array<i64: 16, 128>}, {pipeline_mode = #tpu.pipeline_mode<synchronous>, transform_indices = @transform_2, window_bounds = array<i64: 8, 128>}, {transform_indices = @transform_3, window_bounds = array<i64: 32, 16>}, {transform_indices = @transform_4, window_bounds = array<i64: 256, 128>}]} {
    %c0 = arith.constant 0 : index
    %c0_0 = arith.constant 0 : index
    %0 = vector.load %arg4[%c0, %c0_0] : memref<32x16xf32, #tpu.memory_space<vmem>>, vector<32x16xf32>
    %c0_1 = arith.constant 0 : index
    %c0_2 = arith.constant 0 : index
    %1 = vector.load %arg2[%c0_1, %c0_2] : memref<16x128xf32, #tpu.memory_space<vmem>>, vector<16x128xf32>
    %cst = arith.constant dense<0.000000e+00> : vector<32x128xf32>
    %2 = tpu.matmul %0, %1, %cst {dimension_numbers = #tpu.dot_dimension_numbers<[1], [0], [0], [1], [0, 0, 1, 1], [], []>} : vector<32x16xf32>, vector<16x128xf32>, vector<32x128xf32> -> vector<32x128xf32>
    %c0_3 = arith.constant 0 : index
    %c0_4 = arith.constant 0 : index
    %3 = vector.load %arg6[%c0_3, %c0_4] : memref<32x128xf32, #tpu.memory_space<vmem>>, vector<32x128xf32>
    tpu.vector_store %arg6[%c0_3, %c0_4], %2 {strides = array<i32>} : memref<32x128xf32, #tpu.memory_space<vmem>>, vector<32x128xf32>,
    %c0_5 = arith.constant 0 : index
    %c0_6 = arith.constant 0 : index
    %4 = vector.load %arg3[%c0_5, %c0_6] : memref<8x128xf32, #tpu.memory_space<vmem>>, vector<8x128xf32>
    %cst_7 = arith.constant 4.470000e-01 : f32
    %5 = vector.broadcast %cst_7 : f32 to vector<120x128xf32>
    %c0_8 = arith.constant 0 : index
    %c0_9 = arith.constant 0 : index
    %6 = vector.load %arg6[%c0_8, %c0_9] : memref<32x128xf32, #tpu.memory_space<vmem>>, vector<16x128xf32>
    %c0_10 = arith.constant 0 : index
    %c0_11 = arith.constant 0 : index
    %7 = vector.load %arg1[%c0_10, %c0_11] : memref<8x16xf32, #tpu.memory_space<vmem>>, vector<8x16xf32>
    %cst_12 = arith.constant dense<0.000000e+00> : vector<8x128xf32>
    %8 = tpu.matmul %7, %6, %cst_12 {dimension_numbers = #tpu.dot_dimension_numbers<[1], [0], [0], [1], [0, 0, 1, 1], [], []>} : vector<8x16xf32>, vector<16x128xf32>, vector<8x128xf32> -> vector<8x128xf32>
    %9 = arith.addf %8, %4 : vector<8x128xf32>
    %c0_13 = arith.constant 0 : index
    %c0_14 = arith.constant 0 : index
    %10 = vector.load %arg5[%c0_13, %c0_14] : memref<256x128xf32, #tpu.memory_space<vmem>>, vector<8x128xf32>
    tpu.vector_store %arg5[%c0_13, %c0_14], %9 {strides = array<i32>} : memref<256x128xf32, #tpu.memory_space<vmem>>, vector<8x128xf32>,
    %c8 = arith.constant 8 : index
    %c0_15 = arith.constant 0 : index
    %11 = vector.load %arg5[%c8, %c0_15] : memref<256x128xf32, #tpu.memory_space<vmem>>, vector<120x128xf32>
    tpu.vector_store %arg5[%c8, %c0_15], %5 {strides = array<i32>} : memref<256x128xf32, #tpu.memory_space<vmem>>, vector<120x128xf32>,
    %c16 = arith.constant 16 : index
    %c0_16 = arith.constant 0 : index
    %12 = vector.load %arg6[%c16, %c0_16] : memref<32x128xf32, #tpu.memory_space<vmem>>, vector<16x128xf32>
    %c0_17 = arith.constant 0 : index
    %c0_18 = arith.constant 0 : index
    %13 = vector.load %arg1[%c0_17, %c0_18] : memref<8x16xf32, #tpu.memory_space<vmem>>, vector<8x16xf32>
    %cst_19 = arith.constant dense<0.000000e+00> : vector<8x128xf32>
    %14 = tpu.matmul %13, %12, %cst_19 {dimension_numbers = #tpu.dot_dimension_numbers<[1], [0], [0], [1], [0, 0, 1, 1], [], []>} : vector<8x16xf32>, vector<16x128xf32>, vector<8x128xf32> -> vector<8x128xf32>
    %15 = arith.addf %14, %4 : vector<8x128xf32>
    %c128 = arith.constant 128 : index
    %c0_20 = arith.constant 0 : index
    %16 = vector.load %arg5[%c128, %c0_20] : memref<256x128xf32, #tpu.memory_space<vmem>>, vector<8x128xf32>
    tpu.vector_store %arg5[%c128, %c0_20], %15 {strides = array<i32>} : memref<256x128xf32, #tpu.memory_space<vmem>>, vector<8x128xf32>,
    %c136 = arith.constant 136 : index
    %c0_21 = arith.constant 0 : index
    %17 = vector.load %arg5[%c136, %c0_21] : memref<256x128xf32, #tpu.memory_space<vmem>>, vector<120x128xf32>
    tpu.vector_store %arg5[%c136, %c0_21], %5 {strides = array<i32>} : memref<256x128xf32, #tpu.memory_space<vmem>>, vector<120x128xf32>,
    return
  }
  func.func @transform_0(%arg0: i32) -> (i32, i32) {
    %c0_i32 = arith.constant 0 : i32
    %c0_i32_0 = arith.constant 0 : i32
    %c0_i32_1 = arith.constant 0 : i32
    return %c0_i32, %c0_i32_0 : i32, i32
  }
  func.func @transform_1(%arg0: i32) -> (i32, i32) {
    %c0_i32 = arith.constant 0 : i32
    %c0_i32_0 = arith.constant 0 : i32
    %c0_i32_1 = arith.constant 0 : i32
    return %c0_i32, %c0_i32_0 : i32, i32
  }
  func.func @transform_2(%arg0: i32) -> (i32, i32) {
    %c0_i32 = arith.constant 0 : i32
    %c0_i32_0 = arith.constant 0 : i32
    %c0_i32_1 = arith.constant 0 : i32
    return %c0_i32, %c0_i32_0 : i32, i32
  }
  func.func @transform_3(%arg0: i32) -> (i32, i32) {
    %c0_i32 = arith.constant 0 : i32
    %c0_i32_0 = arith.constant 0 : i32
    return %arg0, %c0_i32 : i32, i32
  }
  func.func @transform_4(%arg0: i32) -> (i32, i32) {
    %c0_i32 = arith.constant 0 : i32
    %c0_i32_0 = arith.constant 0 : i32
    return %arg0, %c0_i32 : i32, i32
  }
}

</mosaic_0001>

<bundles_post_ra>
// kernel: tpu_custom_call.1
= control target key start
LH: loop header
LB: loop body
LE: loop exit
PB: predicated region body
PF: predicated region fallthrough
CT: control target
= control target key end

     0   :  { %9 = vsyncpa [#allocation4], 0  ;;  %s918_s0 = inlined_call_operand.vmem [shape: f32[8,16], index: 0, kind: input, shape index: {}]   ;;  %s919_s1 = inlined_call_operand.vmem [shape: f32[16,128], index: 1, kind: input, shape index: {}]   ;;  %s920_s2 = inlined_call_operand.vmem [shape: f32[8,128], index: 2, kind: input, shape index: {}]   ;;  %s921_s3 = inlined_call_operand.vmem [shape: f32[128,16], index: 3, kind: input, shape index: {}]   ;;  %s922_s4 = inlined_call_operand.hbm [shape: f32[1024,128], index: 4, kind: output, shape index: {}]  }
   0x1   :  { %11 = vsyncpa [#allocation4 + $0x1], 0  ;;  %s760_s15 = smov 0   ;;  %s762_s16 = smov 0  }
   0x2   :  { %s764_s17 = smov 0   ;;  %s766_s18 = smov 0  }
   0x3 LB: > { %s781_s19 = sadd.s32 4294967295, %s727_s18   ;;  %s568_s20 = sadd.s32 4294967294, %s727_s18   ;;  %s727_s18 = sphi %s766_s18, %s928_s18   ;;  %s723_s17 = sphi %s764_s17, %s927_s17   ;;  %s719_s16 = sphi %s762_s16, %s926_s16   ;;  %s715_s15 = sphi %s760_s15, %s925_s15  }
   0x4   : > { %s785_s21 = sadd.s32 1, %s727_s18   ;;  %s113_s22 = sadd.s32 1, %s723_s17 }
   0x5   : > { %s110_s23 = ssub.s32 %s727_s18, %s785_s21  ;;  %p123_p0 = scmp.ne.s32.totalorder %s723_s17, %s719_s16 }
   0x6   : > { %p111_p1 = scmp.eq.s32.totalorder %s110_s23, 0  ;;  %p124_p2 = scmp.eq.s32.totalorder %s781_s19, 3 }
   0x7   : > { %p129_p3 = scmp.ne.s32.totalorder %s719_s16, %s715_s15  ;;  %p130_p4 = scmp.eq.s32.totalorder %s568_s20, 3 }
   0x8   : > { %s796_s24 = scalar_select %p111_p1, %s723_s17, %s113_s22  }
   0x9   : > { %p798_p5 = por %p124_p2, %p123_p0  ;;  %p802_p6 = por %p130_p4, %p129_p3 }
   0xa   : > { %p571_p7 = scmp.ge.s32.totalorder %s727_s18, 1  ;;  %p166_p8 = scmp.lt.s32.totalorder %s727_s18, 5 }
   0xc   : > { %p167_p9 = pnand %p571_p7, %p166_p8 }
   0xd   : > { %s573_s5 = sshll.u32 (!%p167_p9), %s781_s19, 2  ;;  %s189_s12 = sand.u32 (!%p167_p9), 1, %s719_s16  }
   0xe   : > { %170 = sbr.rel (%p167_p9) target bundleno = 433 (0x1b1), region = 36  ;;  %p193_p10 = scmp.lt.s32.totalorder (!%p167_p9), %s573_s5, 15 }
   0xf   : > { %s572_s13 = sshll.u32 (!%p167_p9), %s189_s12, 8  ;;  %s586_s23 = sshll.u32 (!%p167_p9), %s781_s19, 12 }
  0x10   : > { %s830_s14 = scalar_lea.vmem (!%p167_p9), [#allocation3], %s572_s13  ;;  %s871_s30 = scalar_lea.hbm (!%p167_p9), %s922_s4, %s586_s23 }
  0x11   : > { %s506_s27 = sshll.u32 (!%p167_p9), %s830_s14, 4  ;;  %s873_s27 = int_to_ptr.vmem [resolvable:$true] %s506_s27 }
  0x12   : > { %s667_s19 = scalar_lea.vmem (!%p167_p9), %s873_s27, 4096 }
  0x13   : > { %v204_v0 = vld [vmem:[%s919_s1 + $0x8] sm:$0xff]  ;;  %v203_v1 = vld [vmem:[%s919_s1] sm:$0xff]  ;;  %s930_s5 = smov (!%p193_p10, %s573_s5), 15  ;;  %vm205_vm0 = vcmask 130048   ;;  %v729_v6 = vmov 0.0   ;;  %vm730_vm1 = vmmov 0   ;;  %p668_p11 = scmp.ne.s32.totalorder %s873_s27, %s667_s19 }
  0x14   : > { %599 = vmatprep.subr.mxu0 %v204_v0  ;;  %s574_s6 = sshll.u32 %s930_s5, 3  ;;  %609 = vmatprep.subr.mxu1 %v729_v6  ;;  %v310_v8 = vld [vmem:[%s918_s0] sm:$0xff]  ;;  %v731_v12 = vmov 0.447   ;;  %s878_s5 = scalar_lea.sflag [#allocation4], %s189_s12 }
  0x15   : > { %600 = vmatpush3.msra.mxu0 %v204_v0  ;;  %s196_s9 = scalar_lea.vmem %s921_s3, %s574_s6  ;;  %613 = vmatprep.mubr.msk.f32.mxu1 %vm730_vm1, %v729_v6  ;;  %385 = vst [vmem:[%s830_s14 + $0x8] sm:$0xff] %v731_v12  ;;  %386 = vst [vmem:[%s830_s14 + $0x10] sm:$0xff] %v731_v12  ;;  %v307_v13 = vld [vmem:[%s920_s2] sm:$0xff]  ;;  %p669_p12 = pnand %p668_p11, %p798_p5 }
  0x16   : > { %601 = vmatprep.subr.mxu0 %v203_v1  ;;  %v199_v2 = vld [vmem:[%s196_s9] sm:$0xff]  ;;  %v200_v3 = vld [vmem:[%s196_s9 + $0x8] sm:$0xff]  ;;  %v201_v4 = vld [vmem:[%s196_s9 + $0x10] sm:$0xff]  ;;  %387 = vst [vmem:[%s830_s14 + $0x18] sm:$0xff] %v731_v12  ;;  %s732_s6 = smov [#allocation3]  }
  0x17   : > { %602 = vmatpush3.msra.mxu0 %v203_v1  ;;  %603 = vmatprep.mubr.msk.f32.mxu0 %vm205_vm0, %v199_v2  ;;  %v202_v5 = vld [vmem:[%s196_s9 + $0x18] sm:$0xff]  ;;  %388 = vst [vmem:[%s830_s14 + $0x20] sm:$0xff] %v731_v12  ;;  %389 = vst [vmem:[%s830_s14 + $0x28] sm:$0xff] %v731_v12  ;;  %p670_p13 = pneg %p669_p12  ;;  %s671_s7 = sshll.u32 %s732_s6, 4  ;;  %s672_s7 = int_to_ptr.vmem [resolvable:$false] %s671_s7 }
  0x18   : > { %604 = vmatmul.mubr.msk.f32.vlgmr.msra.gmra.mxu0 %vm205_vm0, %v200_v3  ;;  %390 = vst [vmem:[%s830_s14 + $0x30] sm:$0xff] %v731_v12  ;;  %391 = vst [vmem:[%s830_s14 + $0x38] sm:$0xff] %v731_v12  ;;  %s673_s8 = scalar_lea.vmem %s672_s7, 8192  ;;  %p674_p0 = scmp.lt.s32.totalorder %s873_s27, %s672_s7 }
  0x19   : > { %606 = vmatprep.mubr.msk.f32.mxu0 %vm205_vm0, %v201_v4  ;;  %392 = vst [vmem:[%s830_s14 + $0x40] sm:$0xff] %v731_v12  ;;  %393 = vst [vmem:[%s830_s14 + $0x48] sm:$0xff] %v731_v12  ;;  %p675_p1 = scmp.lt.s32.totalorder %s673_s8, %s667_s19 }
  0x1a   : > { %394 = vst [vmem:[%s830_s14 + $0x50] sm:$0xff] %v731_v12  ;;  %395 = vst [vmem:[%s830_s14 + $0x58] sm:$0xff] %v731_v12 }
  0x1b   : > { %396 = vst [vmem:[%s830_s14 + $0x60] sm:$0xff] %v731_v12  ;;  %397 = vst [vmem:[%s830_s14 + $0x68] sm:$0xff] %v731_v12  ;;  %p676_p2 = por %p675_p1, %p674_p0 }
  0x1c   : > { %607 = vmatmul.mubr.msk.f32.gmra.mxu0 %vm205_vm0, %v202_v5  ;;  %398 = vst [vmem:[%s830_s14 + $0x70] sm:$0xff] %v731_v12  ;;  %399 = vst [vmem:[%s830_s14 + $0x78] sm:$0xff] %v731_v12 }
  0x1d   : > { %477 = vst [vmem:[%s830_s14 + $0x88] sm:$0xff] %v731_v12  ;;  %478 = vst [vmem:[%s830_s14 + $0x90] sm:$0xff] %v731_v12  ;;  %p677_p3 = pnand %p676_p2, %p670_p13 }
  0x1e   : > { %479 = vst [vmem:[%s830_s14 + $0x98] sm:$0xff] %v731_v12  ;;  %480 = vst [vmem:[%s830_s14 + $0xa0] sm:$0xff] %v731_v12 }
  0x1f   : > { %481 = vst [vmem:[%s830_s14 + $0xa8] sm:$0xff] %v731_v12  ;;  %482 = vst [vmem:[%s830_s14 + $0xb0] sm:$0xff] %v731_v12 }
  0x20   : > { %483 = vst [vmem:[%s830_s14 + $0xb8] sm:$0xff] %v731_v12  ;;  %484 = vst [vmem:[%s830_s14 + $0xc0] sm:$0xff] %v731_v12 }
  0x21   : > { %485 = vst [vmem:[%s830_s14 + $0xc8] sm:$0xff] %v731_v12  ;;  %486 = vst [vmem:[%s830_s14 + $0xd0] sm:$0xff] %v731_v12 }
  0x22   : > { %487 = vst [vmem:[%s830_s14 + $0xd8] sm:$0xff] %v731_v12  ;;  %488 = vst [vmem:[%s830_s14 + $0xe0] sm:$0xff] %v731_v12 }
  0x23   : > { %489 = vst [vmem:[%s830_s14 + $0xe8] sm:$0xff] %v731_v12  ;;  %490 = vst [vmem:[%s830_s14 + $0xf0] sm:$0xff] %v731_v12 }
  0x24   : > { %491 = vst [vmem:[%s830_s14 + $0xf8] sm:$0xff] %v731_v12 }
  0xd8   : > { %v605_v7 = vpop.f32.mrf.mxu0 }
  0xd9   : > { %610 = vmatpush3.msra.mxu1 %v605_v7 }
  0xda   : > { %v284_v9 = vpop.f32.mrf.mxu0  ;;  %611 = vmatprep.subr.mxu1 %v729_v6 }
  0xdb   : > { %612 = vmatpush3.msra.mxu1 %v284_v9 }
  0xdc   : > { %v608_v10 = vpop.f32.mrf.mxu0  ;;  %614 = vmatmul.mubr.msk.f32.vlgmr.msra.gmra.mxu1 %vm205_vm0, %v310_v8  ;;  %616 = vmatprep.subr.mxu1 %v729_v6 }
  0xdd   : > { %617 = vmatpush3.msra.mxu1 %v608_v10  ;;  %620 = vmatprep.mubr.msk.f32.mxu1 %vm730_vm1, %v729_v6 }
  0xde   : > { %v294_v11 = vpop.f32.mrf.mxu0  ;;  %618 = vmatprep.subr.mxu1 %v729_v6 }
  0xdf   : > { %619 = vmatpush3.msra.mxu1 %v294_v11 }
  0xe0   : > { %621 = vmatmul.mubr.msk.f32.vlgmr.msra.gmra.mxu1 %vm205_vm0, %v310_v8 }
 0x19c   : > { %v380_v14 = vpop.f32.mrf.mxu1 }
 0x19d   : > { %v381_v15 = vadd.f32 %v380_v14, %v307_v13 }
 0x19e   : > { %v615_v16 = vpop.f32.mrf.mxu1 }
 0x19f   : > { %384 = vst [vmem:[%s830_s14] sm:$0xff] %v381_v15 }
 0x1a0   : > { %v472_v17 = vpop.f32.mrf.mxu1 }
 0x1a1   : > { %v473_v18 = vadd.f32 %v472_v17, %v307_v13 }
 0x1a2   : > { %v622_v19 = vpop.f32.mrf.mxu1 }
 0x1a3   : > { %476 = vst [vmem:[%s830_s14 + $0x80] sm:$0xff] %v473_v18 }
 0x1a4   : > { %680 = shalt.err (!%p677_p3)
}
 0x1a5   : > { %s681_s9 = scalar_lea.hbm %s871_s30, 4096  ;;  %s685_s12 = scalar_lea.hbm %s922_s4, 16384 }
 0x1a6   : > { %p682_p4 = scmp.ne.s32.totalorder %s871_s30, %s681_s9  ;;  %p686_p9 = scmp.lt.s32.totalorder %s871_s30, %s922_s4 }
 0x1a7   : > { %p687_p10 = scmp.lt.s32.totalorder %s685_s12, %s681_s9 }
 0x1a8   : > { %p683_p7 = pnand %p682_p4, %p798_p5 }
 0x1a9   : > { %p688_p11 = por %p687_p10, %p686_p9 }
 0x1aa   : > { %p684_p8 = pneg %p683_p7 }
 0x1ac   : > { %p689_p12 = pnand %p688_p11, %p684_p8 }
 0x1ae   : > { %692 = shalt.err (!%p689_p12)
}
 0x1af   : > { %s733_s20 = smov 128   ;;  %s734_s22 = smov 8  }
 0x1b0   : > { %623 = dma.vmem_to_hbm [thread:$0]  (%p798_p5), %s873_s27, 4096, %s871_s30, %s878_s5, %s733_s20, %s733_s20, %s734_s22  }
 0x1b1 PF: > { %p629_p13 = scmp.ge.s32.totalorder %s727_s18, 2  ;;  %s521_s23 = sand.u32 1, %s715_s15  }
 0x1b2   : > { %s522_s28 = scalar_lea.sflag [#allocation4], %s521_s23 }
 0x1b3   : > { %p626_p0 = pnand %p629_p13, %p802_p6 }
 0x1b5   : > { %p627_p1 = pneg %p626_p0 }
 0x1b7   : > { %710 = dma.done.wait (%p627_p1), %s522_s28, 4096  }
 0x1b8   : > { %712 = vsyncadd (%p627_p1), %s522_s28, 4294963200  ;;  %p14_p2 = scmp.ge.s32.totalorder %s785_s21, 6   ;;  %s925_s15 = smov %s719_s16 }
 0x1b9   : > { %s926_s16 = smov %s723_s17  ;;  %s927_s17 = smov %s796_s24 }
 0x1ba   : > { %s928_s18 = smov %s785_s21  ;;  %16 = sbr.rel (!%p14_p2) target bundleno = 3 (0x3), region = 71 }
 0x1bf   :  { %527 = vsyncpa [#allocation4], 1 }
 0x1c0   :  { %529 = vsyncpa [#allocation4 + $0x1], 1 }

// kernel: tpu_custom_call.1
= control target key start
LH: loop header
LB: loop body
LE: loop exit
PB: predicated region body
PF: predicated region fallthrough
CT: control target
= control target key end

     0   :  { %9 = vsyncpa [#allocation4], 0  ;;  %s918_s0 = inlined_call_operand.vmem [shape: f32[8,16], index: 0, kind: input, shape index: {}]   ;;  %s919_s1 = inlined_call_operand.vmem [shape: f32[16,128], index: 1, kind: input, shape index: {}]   ;;  %s920_s2 = inlined_call_operand.vmem [shape: f32[8,128], index: 2, kind: input, shape index: {}]   ;;  %s921_s3 = inlined_call_operand.vmem [shape: f32[128,16], index: 3, kind: input, shape index: {}]   ;;  %s922_s4 = inlined_call_operand.hbm [shape: f32[1024,128], index: 4, kind: output, shape index: {}]  }
   0x1   :  { %11 = vsyncpa [#allocation4 + $0x1], 0  ;;  %s760_s15 = smov 0   ;;  %s762_s16 = smov 0  }
   0x2   :  { %s764_s17 = smov 0   ;;  %s766_s18 = smov 0  }
   0x3 LB: > { %s781_s19 = sadd.s32 4294967295, %s727_s18   ;;  %s568_s20 = sadd.s32 4294967294, %s727_s18   ;;  %s727_s18 = sphi %s766_s18, %s928_s18   ;;  %s723_s17 = sphi %s764_s17, %s927_s17   ;;  %s719_s16 = sphi %s762_s16, %s926_s16   ;;  %s715_s15 = sphi %s760_s15, %s925_s15  }
   0x4   : > { %s785_s21 = sadd.s32 1, %s727_s18   ;;  %s113_s22 = sadd.s32 1, %s723_s17 }
   0x5   : > { %s110_s23 = ssub.s32 %s727_s18, %s785_s21  ;;  %p123_p0 = scmp.ne.s32.totalorder %s723_s17, %s719_s16 }
   0x6   : > { %p111_p1 = scmp.eq.s32.totalorder %s110_s23, 0  ;;  %p124_p2 = scmp.eq.s32.totalorder %s781_s19, 3 }
   0x7   : > { %p129_p3 = scmp.ne.s32.totalorder %s719_s16, %s715_s15  ;;  %p130_p4 = scmp.eq.s32.totalorder %s568_s20, 3 }
   0x8   : > { %s796_s24 = scalar_select %p111_p1, %s723_s17, %s113_s22  }
   0x9   : > { %p798_p5 = por %p124_p2, %p123_p0  ;;  %p802_p6 = por %p130_p4, %p129_p3 }
   0xa   : > { %p571_p7 = scmp.ge.s32.totalorder %s727_s18, 1  ;;  %p166_p8 = scmp.lt.s32.totalorder %s727_s18, 5 }
   0xc   : > { %p167_p9 = pnand %p571_p7, %p166_p8 }
   0xd   : > { %s573_s5 = sshll.u32 (!%p167_p9), %s781_s19, 2  ;;  %s189_s12 = sand.u32 (!%p167_p9), 1, %s719_s16  }
   0xe   : > { %170 = sbr.rel (%p167_p9) target bundleno = 433 (0x1b1), region = 36  ;;  %p193_p10 = scmp.lt.s32.totalorder (!%p167_p9), %s573_s5, 15 }
   0xf   : > { %s572_s13 = sshll.u32 (!%p167_p9), %s189_s12, 8  ;;  %s586_s23 = sshll.u32 (!%p167_p9), %s781_s19, 12 }
  0x10   : > { %s830_s14 = scalar_lea.vmem (!%p167_p9), [#allocation3], %s572_s13  ;;  %s871_s30 = scalar_lea.hbm (!%p167_p9), %s922_s4, %s586_s23 }
  0x11   : > { %s506_s27 = sshll.u32 (!%p167_p9), %s830_s14, 4  ;;  %s873_s27 = int_to_ptr.vmem [resolvable:$true] %s506_s27 }
  0x12   : > { %s667_s19 = scalar_lea.vmem (!%p167_p9), %s873_s27, 4096 }
  0x13   : > { %v204_v0 = vld [vmem:[%s919_s1 + $0x8] sm:$0xff]  ;;  %v203_v1 = vld [vmem:[%s919_s1] sm:$0xff]  ;;  %s930_s5 = smov (!%p193_p10, %s573_s5), 15  ;;  %vm205_vm0 = vcmask 130048   ;;  %v729_v6 = vmov 0.0   ;;  %vm730_vm1 = vmmov 0   ;;  %p668_p11 = scmp.ne.s32.totalorder %s873_s27, %s667_s19 }
  0x14   : > { %599 = vmatprep.subr.mxu0 %v204_v0  ;;  %s574_s6 = sshll.u32 %s930_s5, 3  ;;  %609 = vmatprep.subr.mxu1 %v729_v6  ;;  %v310_v8 = vld [vmem:[%s918_s0] sm:$0xff]  ;;  %v731_v12 = vmov 0.447   ;;  %s878_s5 = scalar_lea.sflag [#allocation4], %s189_s12 }
  0x15   : > { %600 = vmatpush3.msra.mxu0 %v204_v0  ;;  %s196_s9 = scalar_lea.vmem %s921_s3, %s574_s6  ;;  %613 = vmatprep.mubr.msk.f32.mxu1 %vm730_vm1, %v729_v6  ;;  %385 = vst [vmem:[%s830_s14 + $0x8] sm:$0xff] %v731_v12  ;;  %386 = vst [vmem:[%s830_s14 + $0x10] sm:$0xff] %v731_v12  ;;  %v307_v13 = vld [vmem:[%s920_s2] sm:$0xff]  ;;  %p669_p12 = pnand %p668_p11, %p798_p5 }
  0x16   : > { %601 = vmatprep.subr.mxu0 %v203_v1  ;;  %v199_v2 = vld [vmem:[%s196_s9] sm:$0xff]  ;;  %v200_v3 = vld [vmem:[%s196_s9 + $0x8] sm:$0xff]  ;;  %v201_v4 = vld [vmem:[%s196_s9 + $0x10] sm:$0xff]  ;;  %387 = vst [vmem:[%s830_s14 + $0x18] sm:$0xff] %v731_v12  ;;  %s732_s6 = smov [#allocation3]  }
  0x17   : > { %602 = vmatpush3.msra.mxu0 %v203_v1  ;;  %603 = vmatprep.mubr.msk.f32.mxu0 %vm205_vm0, %v199_v2  ;;  %v202_v5 = vld [vmem:[%s196_s9 + $0x18] sm:$0xff]  ;;  %388 = vst [vmem:[%s830_s14 + $0x20] sm:$0xff] %v731_v12  ;;  %389 = vst [vmem:[%s830_s14 + $0x28] sm:$0xff] %v731_v12  ;;  %p670_p13 = pneg %p669_p12  ;;  %s671_s7 = sshll.u32 %s732_s6, 4  ;;  %s672_s7 = int_to_ptr.vmem [resolvable:$false] %s671_s7 }
  0x18   : > { %604 = vmatmul.mubr.msk.f32.vlgmr.msra.gmra.mxu0 %vm205_vm0, %v200_v3  ;;  %390 = vst [vmem:[%s830_s14 + $0x30] sm:$0xff] %v731_v12  ;;  %391 = vst [vmem:[%s830_s14 + $0x38] sm:$0xff] %v731_v12  ;;  %s673_s8 = scalar_lea.vmem %s672_s7, 8192  ;;  %p674_p0 = scmp.lt.s32.totalorder %s873_s27, %s672_s7 }
  0x19   : > { %606 = vmatprep.mubr.msk.f32.mxu0 %vm205_vm0, %v201_v4  ;;  %392 = vst [vmem:[%s830_s14 + $0x40] sm:$0xff] %v731_v12  ;;  %393 = vst [vmem:[%s830_s14 + $0x48] sm:$0xff] %v731_v12  ;;  %p675_p1 = scmp.lt.s32.totalorder %s673_s8, %s667_s19 }
  0x1a   : > { %394 = vst [vmem:[%s830_s14 + $0x50] sm:$0xff] %v731_v12  ;;  %395 = vst [vmem:[%s830_s14 + $0x58] sm:$0xff] %v731_v12 }
  0x1b   : > { %396 = vst [vmem:[%s830_s14 + $0x60] sm:$0xff] %v731_v12  ;;  %397 = vst [vmem:[%s830_s14 + $0x68] sm:$0xff] %v731_v12  ;;  %p676_p2 = por %p675_p1, %p674_p0 }
  0x1c   : > { %607 = vmatmul.mubr.msk.f32.gmra.mxu0 %vm205_vm0, %v202_v5  ;;  %398 = vst [vmem:[%s830_s14 + $0x70] sm:$0xff] %v731_v12  ;;  %399 = vst [vmem:[%s830_s14 + $0x78] sm:$0xff] %v731_v12 }
  0x1d   : > { %477 = vst [vmem:[%s830_s14 + $0x88] sm:$0xff] %v731_v12  ;;  %478 = vst [vmem:[%s830_s14 + $0x90] sm:$0xff] %v731_v12  ;;  %p677_p3 = pnand %p676_p2, %p670_p13 }
  0x1e   : > { %479 = vst [vmem:[%s830_s14 + $0x98] sm:$0xff] %v731_v12  ;;  %480 = vst [vmem:[%s830_s14 + $0xa0] sm:$0xff] %v731_v12 }
  0x1f   : > { %481 = vst [vmem:[%s830_s14 + $0xa8] sm:$0xff] %v731_v12  ;;  %482 = vst [vmem:[%s830_s14 + $0xb0] sm:$0xff] %v731_v12 }
  0x20   : > { %483 = vst [vmem:[%s830_s14 + $0xb8] sm:$0xff] %v731_v12  ;;  %484 = vst [vmem:[%s830_s14 + $0xc0] sm:$0xff] %v731_v12 }
  0x21   : > { %485 = vst [vmem:[%s830_s14 + $0xc8] sm:$0xff] %v731_v12  ;;  %486 = vst [vmem:[%s830_s14 + $0xd0] sm:$0xff] %v731_v12 }
  0x22   : > { %487 = vst [vmem:[%s830_s14 + $0xd8] sm:$0xff] %v731_v12  ;;  %488 = vst [vmem:[%s830_s14 + $0xe0] sm:$0xff] %v731_v12 }
  0x23   : > { %489 = vst [vmem:[%s830_s14 + $0xe8] sm:$0xff] %v731_v12  ;;  %490 = vst [vmem:[%s830_s14 + $0xf0] sm:$0xff] %v731_v12 }
  0x24   : > { %491 = vst [vmem:[%s830_s14 + $0xf8] sm:$0xff] %v731_v12 }
  0xd8   : > { %v605_v7 = vpop.f32.mrf.mxu0 }
  0xd9   : > { %610 = vmatpush3.msra.mxu1 %v605_v7 }
  0xda   : > { %v284_v9 = vpop.f32.mrf.mxu0  ;;  %611 = vmatprep.subr.mxu1 %v729_v6 }
  0xdb   : > { %612 = vmatpush3.msra.mxu1 %v284_v9 }
  0xdc   : > { %v608_v10 = vpop.f32.mrf.mxu0  ;;  %614 = vmatmul.mubr.msk.f32.vlgmr.msra.gmra.mxu1 %vm205_vm0, %v310_v8  ;;  %616 = vmatprep.subr.mxu1 %v729_v6 }
  0xdd   : > { %617 = vmatpush3.msra.mxu1 %v608_v10  ;;  %620 = vmatprep.mubr.msk.f32.mxu1 %vm730_vm1, %v729_v6 }
  0xde   : > { %v294_v11 = vpop.f32.mrf.mxu0  ;;  %618 = vmatprep.subr.mxu1 %v729_v6 }
  0xdf   : > { %619 = vmatpush3.msra.mxu1 %v294_v11 }
  0xe0   : > { %621 = vmatmul.mubr.msk.f32.vlgmr.msra.gmra.mxu1 %vm205_vm0, %v310_v8 }
 0x19c   : > { %v380_v14 = vpop.f32.mrf.mxu1 }
 0x19d   : > { %v381_v15 = vadd.f32 %v380_v14, %v307_v13 }
 0x19e   : > { %v615_v16 = vpop.f32.mrf.mxu1 }
 0x19f   : > { %384 = vst [vmem:[%s830_s14] sm:$0xff] %v381_v15 }
 0x1a0   : > { %v472_v17 = vpop.f32.mrf.mxu1 }
 0x1a1   : > { %v473_v18 = vadd.f32 %v472_v17, %v307_v13 }
 0x1a2   : > { %v622_v19 = vpop.f32.mrf.mxu1 }
 0x1a3   : > { %476 = vst [vmem:[%s830_s14 + $0x80] sm:$0xff] %v473_v18 }
 0x1a4   : > { %680 = shalt.err (!%p677_p3)
}
 0x1a5   : > { %s681_s9 = scalar_lea.hbm %s871_s30, 4096  ;;  %s685_s12 = scalar_lea.hbm %s922_s4, 16384 }
 0x1a6   : > { %p682_p4 = scmp.ne.s32.totalorder %s871_s30, %s681_s9  ;;  %p686_p9 = scmp.lt.s32.totalorder %s871_s30, %s922_s4 }
 0x1a7   : > { %p687_p10 = scmp.lt.s32.totalorder %s685_s12, %s681_s9 }
 0x1a8   : > { %p683_p7 = pnand %p682_p4, %p798_p5 }
 0x1a9   : > { %p688_p11 = por %p687_p10, %p686_p9 }
 0x1aa   : > { %p684_p8 = pneg %p683_p7 }
 0x1ac   : > { %p689_p12 = pnand %p688_p11, %p684_p8 }
 0x1ae   : > { %692 = shalt.err (!%p689_p12)
}
 0x1af   : > { %s733_s20 = smov 128   ;;  %s734_s22 = smov 8  }
 0x1b0   : > { %623 = dma.vmem_to_hbm [thread:$0]  (%p798_p5), %s873_s27, 4096, %s871_s30, %s878_s5, %s733_s20, %s733_s20, %s734_s22  }
 0x1b1 PF: > { %p629_p13 = scmp.ge.s32.totalorder %s727_s18, 2  ;;  %s521_s23 = sand.u32 1, %s715_s15  }
 0x1b2   : > { %s522_s28 = scalar_lea.sflag [#allocation4], %s521_s23 }
 0x1b3   : > { %p626_p0 = pnand %p629_p13, %p802_p6 }
 0x1b5   : > { %p627_p1 = pneg %p626_p0 }
 0x1b7   : > { %710 = dma.done.wait (%p627_p1), %s522_s28, 4096  }
 0x1b8   : > { %712 = vsyncadd (%p627_p1), %s522_s28, 4294963200  ;;  %p14_p2 = scmp.ge.s32.totalorder %s785_s21, 6   ;;  %s925_s15 = smov %s719_s16 }
 0x1b9   : > { %s926_s16 = smov %s723_s17  ;;  %s927_s17 = smov %s796_s24 }
 0x1ba   : > { %s928_s18 = smov %s785_s21  ;;  %16 = sbr.rel (!%p14_p2) target bundleno = 3 (0x3), region = 71 }
 0x1bf   :  { %527 = vsyncpa [#allocation4], 1 }
 0x1c0   :  { %529 = vsyncpa [#allocation4 + $0x1], 1 }

</bundles_post_ra>
